<compile_context>
chip_gen: v6e
topology: v6e:2x2x1
jax: 0.10.0
libtpu: 0.0.40
codegen_flags: <defaults>
</compile_context>

<pallas_src>
import jax
import jax.numpy as jnp
from jax.experimental import pallas as pl
from jax.experimental.pallas import tpu as pltpu

BANDITS = 3
HIDDEN = 128
OUT_PAD = 128          # lane-dense output width (>= BANDITS, multiple of 128)
TB_MAX = 512           # batch-tile cap (multiple of 8); safe for v7x 64 MiB VMEM


def _round_up(n, m):
    return ((n + m - 1) // m) * m


def dqn_kernel(x_ref, w1_ref, b1_ref, w2_ref, b2_ref, w3_ref, b3_ref, o_ref):
    x = x_ref[...]                      # [TB, 3]   f32
    w1 = w1_ref[...]                    # [3, 128]  f32

    # fc1: K=3 -> an MXU matmul would be almost all contraction padding.
    # Three VPU broadcast FMAs ([TB,1] * [1,128]) run as free filler instead.
    h1 = (x[:, 0:1] * w1[0:1, :]
          + x[:, 1:2] * w1[1:2, :]
          + x[:, 2:3] * w1[2:3, :]
          + b1_ref[...])
    h1 = jnp.maximum(h1, 0.0)

    # fc2: bf16 operands on the MXU, f32 accumulation, f32 bias/ReLU on the VPU.
    h2 = jnp.dot(h1.astype(jnp.bfloat16), w2_ref[...],
                 preferred_element_type=jnp.float32) + b2_ref[...]
    h2 = jnp.maximum(h2, 0.0)

    # fc3: output columns zero-padded to 128 -> lane-dense [TB, 128] store.
    out = jnp.dot(h2.astype(jnp.bfloat16), w3_ref[...],
                  preferred_element_type=jnp.float32) + b3_ref[...]
    o_ref[...] = out.astype(o_ref.dtype)


def prepare_params(params):
    """One-time conversion to the kernel layout: bf16 MXU weights for fc2/fc3,
    and w3/b3 zero-padded to OUT_PAD columns for a lane-dense output block."""
    w3p = jnp.pad(params["w3"], ((0, 0), (0, OUT_PAD - BANDITS)))
    b3p = jnp.pad(params["b3"], ((0, 0), (0, OUT_PAD - BANDITS)))
    return {
        "w1": params["w1"].astype(jnp.float32),   # fc1 stays on the VPU in f32
        "b1": params["b1"].astype(jnp.float32),
        "w2": params["w2"].astype(jnp.bfloat16),  # MXU operand
        "b2": params["b2"].astype(jnp.float32),
        "w3": w3p.astype(jnp.bfloat16),           # MXU operand, padded to 128 cols
        "b3": b3p.astype(jnp.float32),
    }


def dqn_forward(x, prepped):
    """x: [batch, BANDITS] float32. prepped: output of prepare_params()."""
    batch = x.shape[0]

    # Batch tile: small batches use a single 8-aligned tile; large batches are
    # tiled at TB_MAX rows and pipelined across the grid.
    small = _round_up(batch, 8)
    if small <= TB_MAX:
        tb, padded = small, small
    else:
        tb, padded = TB_MAX, _round_up(batch, TB_MAX)

    if padded != batch:
        x = jnp.pad(x, ((0, padded - batch), (0, 0)))

    grid = (padded // tb,)
    # Weights/biases: full blocks, same index every step -> stay VMEM-resident.
    resident = lambda shape: pl.BlockSpec(shape, lambda i: (0, 0))

    out = pl.pallas_call(
        dqn_kernel,
        out_shape=jax.ShapeDtypeStruct((padded, OUT_PAD), jnp.float32),
        grid=grid,
        in_specs=[
            pl.BlockSpec((tb, BANDITS), lambda i: (i, 0)),   # x, tiled on batch
            resident((BANDITS, HIDDEN)),                      # w1
            resident((1, HIDDEN)),                            # b1
            resident((HIDDEN, HIDDEN)),                       # w2 (bf16)
            resident((1, HIDDEN)),                            # b2
            resident((HIDDEN, OUT_PAD)),                      # w3 padded (bf16)
            resident((1, OUT_PAD)),                           # b3 padded
        ],
        out_specs=pl.BlockSpec((tb, OUT_PAD), lambda i: (i, 0)),
        compiler_params=pltpu.CompilerParams(
            dimension_semantics=("parallel",),
        ),
    )(x, prepped["w1"], prepped["b1"], prepped["w2"], prepped["b2"],
      prepped["w3"], prepped["b3"])

    return out[:batch, :BANDITS]


def init_params(key):
    """Deterministic init mimicking PyTorch's default Linear init:
    U(-1/sqrt(fan_in), 1/sqrt(fan_in)) for both weights and biases."""
    ks = jax.random.split(key, 6)

    def uniform(k, shape, fan_in):
        bound = 1.0 / jnp.sqrt(jnp.float32(fan_in))
        return jax.random.uniform(k, shape, jnp.float32, -bound, bound)

    return {
        # stored as [in, out] (transposed vs. PyTorch [out, in])
        "w1": uniform(ks[0], (BANDITS, HIDDEN), BANDITS),
        "b1": uniform(ks[1], (1, HIDDEN), BANDITS),
        "w2": uniform(ks[2], (HIDDEN, HIDDEN), HIDDEN),
        "b2": uniform(ks[3], (1, HIDDEN), HIDDEN),
        "w3": uniform(ks[4], (HIDDEN, BANDITS), HIDDEN),
        "b3": uniform(ks[5], (1, BANDITS), HIDDEN),
    }


def reference_forward(x, params):
    """Pure-f32 reference, identical math to the PyTorch module."""
    h1 = jnp.maximum(x @ params["w1"] + params["b1"], 0.0)
    h2 = jnp.maximum(h1 @ params["w2"] + params["b2"], 0.0)
    return h2 @ params["w3"] + params["b3"]


def matched_reference(x, prepped):
    """Reference mirroring the kernel's precision choices exactly
    (f32 fc1 FMAs, bf16 MXU operands with f32 accumulation)."""
    w1 = prepped["w1"]
    h1 = (x[:, 0:1] * w1[0:1, :] + x[:, 1:2] * w1[1:2, :]
          + x[:, 2:3] * w1[2:3, :] + prepped["b1"])
    h1 = jnp.maximum(h1, 0.0)
    h2 = jnp.dot(h1.astype(jnp.bfloat16), prepped["w2"],
                 preferred_element_type=jnp.float32) + prepped["b2"]
    h2 = jnp.maximum(h2, 0.0)
    out = jnp.dot(h2.astype(jnp.bfloat16), prepped["w3"],
                  preferred_element_type=jnp.float32) + prepped["b3"]
    return out[:, :BANDITS]


if __name__ == "__main__":
    key = jax.random.PRNGKey(0)
    k_params, k_x = jax.random.split(key)

    params = init_params(k_params)
    prepped = prepare_params(params)

    batch = 8
    x = jax.random.normal(k_x, (batch, BANDITS), jnp.float32)

    out = dqn_forward(x, prepped)
    jax.block_until_ready(out)
    assert out.shape == (batch, BANDITS)

    # Tight check vs. a reference that mirrors the kernel's precision choices.
    ref_matched = matched_reference(x, prepped)
    assert jnp.allclose(out, ref_matched, atol=1e-3, rtol=1e-3)

    # Loose check vs. the full-f32 PyTorch-equivalent forward (bf16 MXU inputs
    # introduce ~1e-3 relative error).
    ref_f32 = reference_forward(x, params)
    assert jnp.allclose(out, ref_f32, atol=5e-2, rtol=5e-2)

    print("KERNEL_OK")
</pallas_src>

<mosaic_0001>
module attributes {stable_mosaic.version = 11 : i64} {
  func.func @dqn_kernel(%arg0: i32, %arg1: memref<8x3xf32, #tpu.memory_space<vmem>>, %arg2: memref<3x128xf32, #tpu.memory_space<vmem>>, %arg3: memref<1x128xf32, #tpu.memory_space<vmem>>, %arg4: memref<128x128xbf16, #tpu.memory_space<vmem>>, %arg5: memref<1x128xf32, #tpu.memory_space<vmem>>, %arg6: memref<128x128xbf16, #tpu.memory_space<vmem>>, %arg7: memref<1x128xf32, #tpu.memory_space<vmem>>, %arg8: memref<8x128xf32, #tpu.memory_space<vmem>>) attributes {dimension_semantics = [#tpu.dimension_semantics<parallel>], iteration_bounds = array<i64: 1>, scalar_prefetch = 0 : i64, scratch_operands = 0 : i64, tpu.core_type = #tpu.core_type<tc>, window_params = [{transform_indices = @transform_0, window_bounds = array<i64: 8, 3>}, {pipeline_mode = #tpu.pipeline_mode<synchronous>, transform_indices = @transform_1, window_bounds = array<i64: 3, 128>}, {pipeline_mode = #tpu.pipeline_mode<synchronous>, transform_indices = @transform_2, window_bounds = array<i64: 1, 128>}, {pipeline_mode = #tpu.pipeline_mode<synchronous>, transform_indices = @transform_3, window_bounds = array<i64: 128, 128>}, {pipeline_mode = #tpu.pipeline_mode<synchronous>, transform_indices = @transform_4, window_bounds = array<i64: 1, 128>}, {pipeline_mode = #tpu.pipeline_mode<synchronous>, transform_indices = @transform_5, window_bounds = array<i64: 128, 128>}, {pipeline_mode = #tpu.pipeline_mode<synchronous>, transform_indices = @transform_6, window_bounds = array<i64: 1, 128>}, {transform_indices = @transform_7, window_bounds = array<i64: 8, 128>}]} {
    %c0 = arith.constant 0 : index
    %c0_0 = arith.constant 0 : index
    %0 = vector.load %arg1[%c0, %c0_0] : memref<8x3xf32, #tpu.memory_space<vmem>>, vector<8x3xf32>
    %c0_1 = arith.constant 0 : index
    %c0_2 = arith.constant 0 : index
    %1 = vector.load %arg2[%c0_1, %c0_2] : memref<3x128xf32, #tpu.memory_space<vmem>>, vector<3x128xf32>
    %2 = vector.extract_strided_slice %0 {offsets = [0, 0], sizes = [8, 1], strides = [1, 1]} : vector<8x3xf32> to vector<8x1xf32>
    %3 = vector.extract_strided_slice %1 {offsets = [0, 0], sizes = [1, 128], strides = [1, 1]} : vector<3x128xf32> to vector<1x128xf32>
    %4 = vector.broadcast %2 : vector<8x1xf32> to vector<8x128xf32>
    %5 = vector.broadcast %3 : vector<1x128xf32> to vector<8x128xf32>
    %6 = arith.mulf %4, %5 : vector<8x128xf32>
    %7 = vector.extract_strided_slice %0 {offsets = [0, 1], sizes = [8, 1], strides = [1, 1]} : vector<8x3xf32> to vector<8x1xf32>
    %8 = vector.extract_strided_slice %1 {offsets = [1, 0], sizes = [1, 128], strides = [1, 1]} : vector<3x128xf32> to vector<1x128xf32>
    %9 = vector.broadcast %7 : vector<8x1xf32> to vector<8x128xf32>
    %10 = vector.broadcast %8 : vector<1x128xf32> to vector<8x128xf32>
    %11 = arith.mulf %9, %10 : vector<8x128xf32>
    %12 = arith.addf %6, %11 : vector<8x128xf32>
    %13 = vector.extract_strided_slice %0 {offsets = [0, 2], sizes = [8, 1], strides = [1, 1]} : vector<8x3xf32> to vector<8x1xf32>
    %14 = vector.extract_strided_slice %1 {offsets = [2, 0], sizes = [1, 128], strides = [1, 1]} : vector<3x128xf32> to vector<1x128xf32>
    %15 = vector.broadcast %13 : vector<8x1xf32> to vector<8x128xf32>
    %16 = vector.broadcast %14 : vector<1x128xf32> to vector<8x128xf32>
    %17 = arith.mulf %15, %16 : vector<8x128xf32>
    %18 = arith.addf %12, %17 : vector<8x128xf32>
    %c0_3 = arith.constant 0 : index
    %c0_4 = arith.constant 0 : index
    %19 = vector.load %arg3[%c0_3, %c0_4] : memref<1x128xf32, #tpu.memory_space<vmem>>, vector<1x128xf32>
    %20 = vector.broadcast %19 : vector<1x128xf32> to vector<8x128xf32>
    %21 = arith.addf %18, %20 : vector<8x128xf32>
    %cst = arith.constant 0.000000e+00 : f32
    %22 = vector.broadcast %cst : f32 to vector<8x128xf32>
    %23 = arith.maximumf %21, %22 : vector<8x128xf32>
    %24 = arith.truncf %23 : vector<8x128xf32> to vector<8x128xbf16>
    %c0_5 = arith.constant 0 : index
    %c0_6 = arith.constant 0 : index
    %25 = vector.load %arg4[%c0_5, %c0_6] : memref<128x128xbf16, #tpu.memory_space<vmem>>, vector<128x128xbf16>
    %cst_7 = arith.constant dense<0.000000e+00> : vector<8x128xf32>
    %26 = tpu.matmul %24, %25, %cst_7 {dimension_numbers = #tpu.dot_dimension_numbers<[1], [0], [0], [1], [0, 0, 1, 1], [], []>} : vector<8x128xbf16>, vector<128x128xbf16>, vector<8x128xf32> -> vector<8x128xf32>
    %c0_8 = arith.constant 0 : index
    %c0_9 = arith.constant 0 : index
    %27 = vector.load %arg5[%c0_8, %c0_9] : memref<1x128xf32, #tpu.memory_space<vmem>>, vector<1x128xf32>
    %28 = vector.broadcast %27 : vector<1x128xf32> to vector<8x128xf32>
    %29 = arith.addf %26, %28 : vector<8x128xf32>
    %cst_10 = arith.constant 0.000000e+00 : f32
    %30 = vector.broadcast %cst_10 : f32 to vector<8x128xf32>
    %31 = arith.maximumf %29, %30 : vector<8x128xf32>
    %32 = arith.truncf %31 : vector<8x128xf32> to vector<8x128xbf16>
    %c0_11 = arith.constant 0 : index
    %c0_12 = arith.constant 0 : index
    %33 = vector.load %arg6[%c0_11, %c0_12] : memref<128x128xbf16, #tpu.memory_space<vmem>>, vector<128x128xbf16>
    %cst_13 = arith.constant dense<0.000000e+00> : vector<8x128xf32>
    %34 = tpu.matmul %32, %33, %cst_13 {dimension_numbers = #tpu.dot_dimension_numbers<[1], [0], [0], [1], [0, 0, 1, 1], [], []>} : vector<8x128xbf16>, vector<128x128xbf16>, vector<8x128xf32> -> vector<8x128xf32>
    %c0_14 = arith.constant 0 : index
    %c0_15 = arith.constant 0 : index
    %35 = vector.load %arg7[%c0_14, %c0_15] : memref<1x128xf32, #tpu.memory_space<vmem>>, vector<1x128xf32>
    %36 = vector.broadcast %35 : vector<1x128xf32> to vector<8x128xf32>
    %37 = arith.addf %34, %36 : vector<8x128xf32>
    %c0_16 = arith.constant 0 : index
    %c0_17 = arith.constant 0 : index
    %38 = vector.load %arg8[%c0_16, %c0_17] : memref<8x128xf32, #tpu.memory_space<vmem>>, vector<8x128xf32>
    tpu.vector_store %arg8[%c0_16, %c0_17], %37 {strides = array<i32>} : memref<8x128xf32, #tpu.memory_space<vmem>>, vector<8x128xf32>,
    return
  }
  func.func @transform_0(%arg0: i32) -> (i32, i32) {
    %c0_i32 = arith.constant 0 : i32
    %c0_i32_0 = arith.constant 0 : i32
    return %arg0, %c0_i32 : i32, i32
  }
  func.func @transform_1(%arg0: i32) -> (i32, i32) {
    %c0_i32 = arith.constant 0 : i32
    %c0_i32_0 = arith.constant 0 : i32
    %c0_i32_1 = arith.constant 0 : i32
    return %c0_i32, %c0_i32_0 : i32, i32
  }
  func.func @transform_2(%arg0: i32) -> (i32, i32) {
    %c0_i32 = arith.constant 0 : i32
    %c0_i32_0 = arith.constant 0 : i32
    %c0_i32_1 = arith.constant 0 : i32
    return %c0_i32, %c0_i32_0 : i32, i32
  }
  func.func @transform_3(%arg0: i32) -> (i32, i32) {
    %c0_i32 = arith.constant 0 : i32
    %c0_i32_0 = arith.constant 0 : i32
    %c0_i32_1 = arith.constant 0 : i32
    return %c0_i32, %c0_i32_0 : i32, i32
  }
  func.func @transform_4(%arg0: i32) -> (i32, i32) {
    %c0_i32 = arith.constant 0 : i32
    %c0_i32_0 = arith.constant 0 : i32
    %c0_i32_1 = arith.constant 0 : i32
    return %c0_i32, %c0_i32_0 : i32, i32
  }
  func.func @transform_5(%arg0: i32) -> (i32, i32) {
    %c0_i32 = arith.constant 0 : i32
    %c0_i32_0 = arith.constant 0 : i32
    %c0_i32_1 = arith.constant 0 : i32
    return %c0_i32, %c0_i32_0 : i32, i32
  }
  func.func @transform_6(%arg0: i32) -> (i32, i32) {
    %c0_i32 = arith.constant 0 : i32
    %c0_i32_0 = arith.constant 0 : i32
    %c0_i32_1 = arith.constant 0 : i32
    return %c0_i32, %c0_i32_0 : i32, i32
  }
  func.func @transform_7(%arg0: i32) -> (i32, i32) {
    %c0_i32 = arith.constant 0 : i32
    %c0_i32_0 = arith.constant 0 : i32
    return %arg0, %c0_i32 : i32, i32
  }
}

</mosaic_0001>

<bundles_post_ra>
// kernel: tpu_custom_call.1
= control target key start
LH: loop header
LB: loop body
LE: loop exit
PB: predicated region body
PF: predicated region fallthrough
CT: control target
= control target key end

     0   :  { %12 = vsyncpa [#allocation3], 0  ;;  %s604_s0 = inlined_call_operand.vmem [shape: f32[8,3], index: 0, kind: input, shape index: {}]   ;;  %s605_s1 = inlined_call_operand.vmem [shape: f32[3,128], index: 1, kind: input, shape index: {}]   ;;  %s606_s2 = inlined_call_operand.vmem [shape: f32[1,128], index: 2, kind: input, shape index: {}]   ;;  %s607_s3 = inlined_call_operand.hbm [shape: bf16[128,128], index: 3, kind: input, shape index: {}]   ;;  %s608_s4 = inlined_call_operand.vmem [shape: f32[1,128], index: 4, kind: input, shape index: {}]   ;;  %s609_s5 = inlined_call_operand.hbm [shape: bf16[128,128], index: 5, kind: input, shape index: {}]   ;;  %s610_s6 = inlined_call_operand.vmem [shape: f32[1,128], index: 6, kind: input, shape index: {}]   ;;  %s611_s7 = inlined_call_operand.hbm [shape: f32[8,128], index: 7, kind: output, shape index: {}]  }
   0x1   :  { %13 = vsyncpa [#allocation6], 0 }
   0x2   :  { %14 = vsyncpa [#allocation4], 0  ;;  %s512_s24 = smov [#allocation2]  }
   0x3   :  { %s26_s25 = sshll.u32 %s512_s24, 4  ;;  %s27_s25 = int_to_ptr.vmem [resolvable:$true] %s26_s25 }
   0x4   :  { %s454_s26 = scalar_lea.vmem %s27_s25, 1024  ;;  %p459_p1 = scmp.lt.s32.totalorder %s27_s25, %s27_s25 }
   0x5   :  { %p455_p0 = scmp.ne.s32.totalorder %s27_s25, %s454_s26  ;;  %p460_p2 = scmp.lt.s32.totalorder %s454_s26, %s454_s26 }
   0x7   :  { %p461_p3 = por %p460_p2, %p459_p1 }
   0x9   :  { %p462_p4 = pnand %p461_p3, %p455_p0 }
   0xb   :  { %465 = shalt.err (!%p462_p4)
}
   0xc   :  { %s513_s27 = smov 64   ;;  %s514_s28 = smov 4  }
   0xd   :  { %32 = dma.hbm_to_vmem [thread:$0]  %s607_s3, 1024, %s27_s25, [#allocation3], %s513_s27, %s513_s27, %s514_s28  }
   0xe   :  { %s515_s8 = smov [#allocation5]  }
   0xf   :  { %s40_s9 = sshll.u32 %s515_s8, 4  ;;  %s41_s9 = int_to_ptr.vmem [resolvable:$true] %s40_s9 }
  0x10   :  { %s474_s10 = scalar_lea.vmem %s41_s9, 1024  ;;  %p479_p6 = scmp.lt.s32.totalorder %s41_s9, %s41_s9 }
  0x11   :  { %p475_p5 = scmp.ne.s32.totalorder %s41_s9, %s474_s10  ;;  %p480_p7 = scmp.lt.s32.totalorder %s474_s10, %s474_s10 }
  0x13   :  { %p481_p8 = por %p480_p7, %p479_p6 }
  0x15   :  { %p482_p9 = pnand %p481_p8, %p475_p5 }
  0x17   :  { %485 = shalt.err (!%p482_p9)
}
  0x18   :  { %46 = dma.hbm_to_vmem [thread:$0]  %s609_s5, 1024, %s41_s9, [#allocation6], %s513_s27, %s513_s27, %s514_s28  }
  0x19   :  { %506 = dma.done.wait [#allocation3], 1024  }
  0x1a   :  { %507 = vsyncadd [#allocation3], 4294966272 }
  0x1b   :  { %508 = dma.done.wait [#allocation6], 1024  }
  0x1c   :  { %509 = vsyncadd [#allocation6], 4294966272  ;;  %v516_v0 = vmov 0   ;;  %v517_v1 = vmov 2   ;;  %v518_v2 = vmov 0.0   ;;  %v56_v3 = vld [vmem:[%s604_s0] sm:$0xff]  ;;  %v63_v19 = vlaneseq }
  0x1d   :  { %426 = vset.pattern.permute.xlu0 %v516_v0  ;;  %428 = vset.pattern.permute.xlu1 %v517_v1  ;;  %v430_v4 = vld [vmem:[#allocation2 + $0x38] sm:$0xff]   ;;  %v431_v5 = vld [vmem:[#allocation2 + $0x30] sm:$0xff]   ;;  %v519_v6 = vmov 1   ;;  %v432_v7 = vld [vmem:[#allocation2 + $0x28] sm:$0xff]   ;;  %vm520_vm0 = vmmov 0   ;;  %s521_s18 = smov [#allocation7]  }
  0x1e   :  { %376 = vmatprep.subr.bf16.mxu0 %v518_v2  ;;  %396 = vmatprep.subr.bf16.mxu1 %v518_v2  ;;  %v433_v8 = vld [vmem:[#allocation2 + $0x20] sm:$0xff]   ;;  %v438_v9 = vld [vmem:[#allocation5 + $0x38] sm:$0xff]   ;;  %v439_v11 = vld [vmem:[#allocation5 + $0x30] sm:$0xff]   ;;  %v64_v20 = vshrl.u32 %v63_v19, 7  ;;  %s329_s19 = sshll.u32 %s521_s18, 4  ;;  %s330_s19 = int_to_ptr.vmem [resolvable:$true] %s329_s19 }
  0x1f   :  { %60 = vperm.xlu0 %426, %v56_v3   ;;  %79 = vperm.xlu1 %428, %v56_v3   ;;  %v434_v10 = vld [vmem:[#allocation2 + $0x18] sm:$0xff]   ;;  %v435_v12 = vld [vmem:[#allocation2 + $0x10] sm:$0xff]   ;;  %v440_v13 = vld [vmem:[#allocation5 + $0x28] sm:$0xff]   ;;  %p491_p11 = scmp.lt.s32.totalorder %s330_s19, %s330_s19 }
  0x20   :  { %377 = vmatpush3.bf16.msra.mxu0 %v430_v4  ;;  %392 = vmatprep.mubr.msk.bf16.mxu0 %vm520_vm0, %v518_v2  ;;  %v436_v14 = vld [vmem:[#allocation2 + $0x8] sm:$0xff]   ;;  %v441_v15 = vld [vmem:[#allocation5 + $0x20] sm:$0xff]   ;;  %v442_v17 = vld [vmem:[#allocation5 + $0x18] sm:$0xff]   ;;  %v65_v21 = vsub.s32 0, %v64_v20  ;;  %v74_v22 = vsub.s32 1, %v64_v20  ;;  %v84_v23 = vsub.s32 2, %v64_v20 }
  0x21   :  { %378 = vmatprep.subr.bf16.mxu0 %v518_v2  ;;  %412 = vmatprep.mubr.msk.bf16.mxu1 %vm520_vm0, %v518_v2  ;;  %v437_v16 = vld [vmem:[#allocation2] sm:$0xff]   ;;  %v443_v18 = vld [vmem:[#allocation5 + $0x10] sm:$0xff]   ;;  %v444_v40 = vld [vmem:[#allocation5 + $0x8] sm:$0xff]  }
  0x22   :  { %397 = vmatpush3.bf16.msra.mxu1 %v438_v9  ;;  %v57_v24 = vld [vmem:[%s605_s1] sm:$0x7] }
  0x23   :  { %427 = vset.pattern.permute.xlu0 %v519_v6  ;;  %398 = vmatprep.subr.bf16.mxu1 %v518_v2  ;;  %v66_v26 = vrot.slane %v57_v24, %v65_v21  ;;  %v75_v27 = vrot.slane %v57_v24, %v74_v22  ;;  %v85_v28 = vrot.slane %v57_v24, %v84_v23  ;;  %v339_v35 = vld [vmem:[%s606_s2] ss:$0 sm:$0xff] }
  0x24   :  { %69 = vperm.xlu0 %427, %v56_v3   ;;  %379 = vmatpush3.bf16.msra.mxu0 %v431_v5  ;;  %v445_v41 = vld [vmem:[#allocation5] sm:$0xff]  }
  0x25   :  { %380 = vmatprep.subr.bf16.mxu0 %v518_v2  ;;  %v340_v42 = vld [vmem:[%s608_s4] ss:$0 sm:$0xff]  ;;  %s486_s4 = scalar_lea.vmem %s330_s19, 128 }
  0x26   :  { %399 = vmatpush3.bf16.msra.mxu1 %v439_v11  ;;  %v349_v50 = vld [vmem:[%s610_s6] ss:$0 sm:$0xff]  ;;  %p487_p10 = scmp.ne.s32.totalorder %s330_s19, %s486_s4  ;;  %p492_p12 = scmp.lt.s32.totalorder %s486_s4, %s486_s4 }
  0x27   :  { %400 = vmatprep.subr.bf16.mxu1 %v518_v2 }
  0x28   :  { %429 = vset.pattern.permute.xlu0 %v517_v1  ;;  %381 = vmatpush3.bf16.msra.mxu0 %v432_v7  ;;  %p493_p13 = por %p492_p12, %p491_p11 }
  0x29   :  { %382 = vmatprep.subr.bf16.mxu0 %v518_v2 }
  0x2a   :  { %401 = vmatpush3.bf16.msra.mxu1 %v440_v13  ;;  %p494_p0 = pnand %p493_p13, %p487_p10 }
  0x2b   :  { %402 = vmatprep.subr.bf16.mxu1 %v518_v2 }
  0x2c   :  { %383 = vmatpush3.bf16.msra.mxu0 %v433_v8 }
  0x2d   :  { %384 = vmatprep.subr.bf16.mxu0 %v518_v2 }
  0x2e   :  { %403 = vmatpush3.bf16.msra.mxu1 %v441_v15 }
  0x2f   :  { %404 = vmatprep.subr.bf16.mxu1 %v518_v2 }
  0x30   :  { %385 = vmatpush3.bf16.msra.mxu0 %v434_v10 }
  0x31   :  { %386 = vmatprep.subr.bf16.mxu0 %v518_v2 }
  0x32   :  { %405 = vmatpush3.bf16.msra.mxu1 %v442_v17 }
  0x33   :  { %406 = vmatprep.subr.bf16.mxu1 %v518_v2 }
  0x34   :  { %387 = vmatpush3.bf16.msra.mxu0 %v435_v12 }
  0x35   :  { %388 = vmatprep.subr.bf16.mxu0 %v518_v2 }
  0x36   :  { %407 = vmatpush3.bf16.msra.mxu1 %v443_v18 }
  0x37   :  { %408 = vmatprep.subr.bf16.mxu1 %v518_v2 }
  0x38   :  { %389 = vmatpush3.bf16.msra.mxu0 %v436_v14 }
  0x39   :  { %390 = vmatprep.subr.bf16.mxu0 %v518_v2 }
  0x3a   :  { %409 = vmatpush3.bf16.msra.mxu1 %v444_v40 }
  0x3b   :  { %410 = vmatprep.subr.bf16.mxu1 %v518_v2 }
  0x3c   :  { %391 = vmatpush3.bf16.msra.mxu0 %v437_v16 }
  0x3e   :  { %411 = vmatpush3.bf16.msra.mxu1 %v445_v41 }
  0x9a   :  { %v61_v25 = vpop.permute.xlu0 %60  ;;  %v80_v29 = vpop.permute.xlu1 %79 }
  0x9b   :  { %v67_v31 = vmul.f32 %v66_v26, %v61_v25  ;;  %v86_v33 = vmul.f32 %v85_v28, %v80_v29 }
  0x9f   :  { %v70_v30 = vpop.permute.xlu0 %69 }
  0xa0   :  { %v76_v32 = vmul.f32 %v75_v27, %v70_v30 }
  0xa2   :  { %v77_v34 = vadd.f32 %v76_v32, %v67_v31 }
  0xa4   :  { %v87_v36 = vadd.f32 %v86_v33, %v77_v34 }
  0xa6   :  { %v95_v37 = vadd.f32 %v339_v35, %v87_v36 }
  0xa8   :  { %v96_v38 = vmax.f32 %v95_v37, 0.0 }
  0xaa   :  { %v97_v39 = vpack.c.bf16 %v96_v38, %v96_v38 }
  0xac   :  { %393 = vmatmul.mubr.bf16.vlgmr.msra.gmra.mxu0 %v97_v39 }
 0x16c   :  { %v203_v43 = vpop.f32.mrf.mxu0 }
 0x16d   :  { %v204_v44 = vadd.f32 %v340_v42, %v203_v43 }
 0x16e   :  { %v394_v45 = vpop.f32.mrf.mxu0 }
 0x16f   :  { %v209_v46 = vmax.f32 %v204_v44, 0.0 }
 0x170   :  { %v206_v47 = vpop.f32.mrf.mxu0 }
 0x171   :  { %v210_v48 = vpack.c.bf16 %v209_v46, %v209_v46 }
 0x172   :  { %v395_v49 = vpop.f32.mrf.mxu0 }
 0x173   :  { %413 = vmatmul.mubr.bf16.vlgmr.msra.gmra.mxu1 %v210_v48 }
 0x233   :  { %v316_v51 = vpop.f32.mrf.mxu1 }
 0x234   :  { %v317_v52 = vadd.f32 %v349_v50, %v316_v51 }
 0x235   :  { %v414_v53 = vpop.f32.mrf.mxu1 }
 0x236   :  { %322 = vst [vmem:[#allocation7] sm:$0xff] %v317_v52 }
 0x237   :  { %v319_v54 = vpop.f32.mrf.mxu1 }
 0x238   :  { %497 = shalt.err (!%p494_p0)
}
 0x239   :  { %332 = dma.vmem_to_hbm [thread:$0]  %s330_s19, 128, %s611_s7, [#allocation4]   ;;  %v415_v55 = vpop.f32.mrf.mxu1 }
 0x23a   :  { %510 = dma.done.wait [#allocation4], 128  }
 0x23b   :  { %511 = vsyncadd [#allocation4], 4294967168 }
 0x23c   :  { %336 = vsyncpa [#allocation3], 1 }
 0x23d   :  { %337 = vsyncpa [#allocation6], 1 }
 0x23e   :  { %338 = vsyncpa [#allocation4], 1 }

</bundles_post_ra>
